<compile_context>
chip_gen: v5e
topology: v5e:2x2
jax: 0.10.0
libtpu: 0.0.40
codegen_flags: <defaults>
</compile_context>

<pallas_src>
import jax
import jax.numpy as jnp
from jax.experimental import pallas as pl
from jax.experimental.pallas import tpu as pltpu

INPUT_SIZE = 50
HIDDEN_SIZE = 50
NUM_STREAMS = 3              # issue / commit_text / commit_code
GATE_PAD = 64                # lane-aligned per-gate width (50 live + 14 zero lanes)
N_PACK = 3 * GATE_PAD        # 192 packed gate lanes (i | g | o)
K_PACK = INPUT_SIZE + 1      # 51: 50 feature rows + 1 "ones" row carrying the bias


def _adv_kernel(x_ref, w_ref, cs_ref):
    """x_ref: (3, B, 51)  w_ref: (3, 51, 192)  cs_ref: (B, 1)."""
    GP = GATE_PAD

    def lstm_feat(k):
        # One (B,51)@(51,192) MXU pass per stream; row 50 of w is the bias and
        # lane 50 of x is 1.0, so the bias is folded into the matmul.
        g = jnp.dot(x_ref[k], w_ref[k], preferred_element_type=jnp.float32)
        i_g = jax.nn.sigmoid(g[:, 0:GP])          # lane-tile offset 0
        g_g = jnp.tanh(g[:, GP:2 * GP])           # half-vreg offset (cheap)
        o_g = jax.nn.sigmoid(g[:, 2 * GP:3 * GP])  # second lane-tile, offset 0
        # h0 = c0 = 0  ->  c = i*g,  h = o * tanh(c).
        # Padded lanes 50:64: pre-act 0 -> 0.5 * tanh(0.5 * 0) = exactly 0.
        return o_g * jnp.tanh(i_g * g_g)           # (B, 64)

    issue_f = lstm_feat(0)
    ctext_f = lstm_feat(1)
    ccode_f = lstm_feat(2)

    # cosine_similarity with PyTorch eps = 1e-8:  dot / max(||a||*||b||, eps)
    #   == dot * rsqrt(max(sa*sb, eps^2)).  Shared issue norm computed once.
    eps2 = jnp.float32(1e-16)
    sa = jnp.sum(issue_f * issue_f, axis=-1, keepdims=True)
    st = jnp.sum(ctext_f * ctext_f, axis=-1, keepdims=True)
    sc = jnp.sum(ccode_f * ccode_f, axis=-1, keepdims=True)
    dt = jnp.sum(issue_f * ctext_f, axis=-1, keepdims=True)
    dc = jnp.sum(issue_f * ccode_f, axis=-1, keepdims=True)
    cs_text = dt * jax.lax.rsqrt(jnp.maximum(sa * st, eps2))
    cs_code = dc * jax.lax.rsqrt(jnp.maximum(sa * sc, eps2))
    cs_ref[...] = jnp.maximum(cs_text, cs_code)    # (B, 1)


@jax.jit
def adv_model_forward(issue_text, commit_text, commit_code, labels, w_packed):
    B = issue_text.shape[0]
    f32 = jnp.float32

    # Single small host-side fusion: stack the 3 streams and append the ones
    # lane that carries the bias through the matmul.  (3, B, 51) ~ 6 KB.
    x3 = jnp.stack([issue_text, commit_text, commit_code]).astype(f32)   # (3,B,50)
    ones = jnp.ones((NUM_STREAMS, B, 1), f32)
    x_packed = jnp.concatenate([x3, ones], axis=-1)                      # (3,B,51)

    vmem = pl.BlockSpec(memory_space=pltpu.MemorySpace.VMEM)
    cs = pl.pallas_call(
        _adv_kernel,
        out_shape=jax.ShapeDtypeStruct((B, 1), jnp.float32),
        in_specs=[vmem, vmem],
        out_specs=vmem,
    )(x_packed, w_packed.astype(f32))

    # Tiny epilogue in the wrapper (per review: fewer kernel refs/DMAs wins).
    cs1 = cs[:, 0]
    logits = jnp.stack([1.0 - cs1, cs1], axis=1)                         # (B, 2)
    loss = jnp.mean(jnp.abs(labels.astype(f32) - cs1))                   # scalar
    return loss, logits


def init_params(key):
    """PyTorch-style per-LSTM params: W_ih (4H,D), b_ih (4H,), b_hh (4H,).

    W_hh is never used (h0 = 0) so it is not materialized.  Gate order is the
    PyTorch (i, f, g, o) order; the forget gate is dead (c0 = 0).
    """
    H, D = HIDDEN_SIZE, INPUT_SIZE
    bound = 1.0 / float(H) ** 0.5
    params = []
    for _ in range(NUM_STREAMS):
        key, k1, k2, k3 = jax.random.split(key, 4)
        params.append({
            "w_ih": jax.random.uniform(k1, (4 * H, D), jnp.float32, -bound, bound),
            "b_ih": jax.random.uniform(k2, (4 * H,), jnp.float32, -bound, bound),
            "b_hh": jax.random.uniform(k3, (4 * H,), jnp.float32, -bound, bound),
        })
    return params


def pack_params(raw_params):
    """Pack the live (i, g, o) gates into one (3, 51, 192) lane-aligned weight.

    Per stream: rows 0:50 hold W_gate^T in 64-lane bands at offsets 0/64/128
    (lanes 50:64 of each band are zero); row 50 holds b_ih + b_hh in the same
    bands (so the x "ones" lane folds the bias into the matmul).
    """
    H, D = HIDDEN_SIZE, INPUT_SIZE
    live_gates = (0, 2, 3)            # i, g, o  (PyTorch order i, f, g, o)
    packed = []
    for p in raw_params:
        b = p["b_ih"] + p["b_hh"]
        wp = jnp.zeros((K_PACK, N_PACK), jnp.float32)
        for slot, g in enumerate(live_gates):
            wp = wp.at[0:D, slot * GATE_PAD:slot * GATE_PAD + H].set(
                p["w_ih"][g * H:(g + 1) * H, :].T)
            wp = wp.at[D, slot * GATE_PAD:slot * GATE_PAD + H].set(
                b[g * H:(g + 1) * H])
        packed.append(wp)
    return jnp.stack(packed, axis=0)   # (3, 51, 192)


def _reference_forward(issue_text, commit_text, commit_code, labels, raw_params):
    """Pure-JAX reference of the module's forward, from the raw (unpacked) params."""
    H = HIDDEN_SIZE
    feats = []
    for p, x in zip(raw_params, (issue_text, commit_text, commit_code)):
        g = x.astype(jnp.float32) @ p["w_ih"].T + p["b_ih"] + p["b_hh"]   # (B, 4H)
        i_g = jax.nn.sigmoid(g[:, 0:H])
        g_g = jnp.tanh(g[:, 2 * H:3 * H])
        o_g = jax.nn.sigmoid(g[:, 3 * H:4 * H])
        feats.append(o_g * jnp.tanh(i_g * g_g))

    def cos(a, b):
        eps = 1e-8
        nab = jnp.linalg.norm(a, axis=-1) * jnp.linalg.norm(b, axis=-1)
        return jnp.sum(a * b, axis=-1) / jnp.maximum(nab, eps)

    cs = jnp.maximum(cos(feats[0], feats[1]), cos(feats[0], feats[2]))
    logits = jnp.stack([1.0 - cs, cs], axis=1)
    loss = jnp.mean(jnp.abs(labels - cs))
    return loss, logits


if __name__ == "__main__":
    key = jax.random.PRNGKey(0)
    key, ki, kt, kc, kl, kp = jax.random.split(key, 6)

    B = 8
    issue_text = jax.random.normal(ki, (B, INPUT_SIZE), jnp.float32)
    commit_text = jax.random.normal(kt, (B, INPUT_SIZE), jnp.float32)
    commit_code = jax.random.normal(kc, (B, INPUT_SIZE), jnp.float32)
    labels = jax.random.bernoulli(kl, 0.5, (B,)).astype(jnp.float32)

    raw_params = init_params(kp)
    w_packed = pack_params(raw_params)

    loss, logits = adv_model_forward(issue_text, commit_text, commit_code,
                                     labels, w_packed)
    jax.block_until_ready((loss, logits))

    ref_loss, ref_logits = _reference_forward(issue_text, commit_text,
                                              commit_code, labels, raw_params)
    assert loss.shape == () and logits.shape == (B, 2)
    assert jnp.allclose(loss, ref_loss, atol=2e-3, rtol=2e-3)
    assert jnp.allclose(logits, ref_logits, atol=2e-3, rtol=2e-3)
    print("KERNEL_OK")
</pallas_src>

<mosaic_0001>
module attributes {stable_mosaic.version = 11 : i64} {
  func.func @_adv_kernel(%arg0: memref<3x8x51xf32, #tpu.memory_space<vmem>>, %arg1: memref<3x51x192xf32, #tpu.memory_space<vmem>>, %arg2: memref<8x1xf32, #tpu.memory_space<vmem>>) attributes {dimension_semantics = [], scalar_prefetch = 0 : i64, scratch_operands = 0 : i64, tpu.core_type = #tpu.core_type<tc>} {
    %c0 = arith.constant 0 : index
    %c0_0 = arith.constant 0 : index
    %c0_1 = arith.constant 0 : index
    %0 = vector.load %arg0[%c0, %c0_0, %c0_1] : memref<3x8x51xf32, #tpu.memory_space<vmem>>, vector<1x8x51xf32>
    %1 = vector.shape_cast %0 : vector<1x8x51xf32> to vector<8x51xf32>
    %c0_2 = arith.constant 0 : index
    %c0_3 = arith.constant 0 : index
    %c0_4 = arith.constant 0 : index
    %2 = vector.load %arg1[%c0_2, %c0_3, %c0_4] : memref<3x51x192xf32, #tpu.memory_space<vmem>>, vector<1x51x192xf32>
    %3 = vector.shape_cast %2 : vector<1x51x192xf32> to vector<51x192xf32>
    %cst = arith.constant dense<0.000000e+00> : vector<8x192xf32>
    %4 = tpu.matmul %1, %3, %cst {dimension_numbers = #tpu.dot_dimension_numbers<[1], [0], [0], [1], [0, 0, 1, 1], [], []>} : vector<8x51xf32>, vector<51x192xf32>, vector<8x192xf32> -> vector<8x192xf32>
    %5 = vector.extract_strided_slice %4 {offsets = [0, 0], sizes = [8, 64], strides = [1, 1]} : vector<8x192xf32> to vector<8x64xf32>
    %6 = arith.negf %5 : vector<8x64xf32>
    %7 = math.exp %6 : vector<8x64xf32>
    %cst_5 = arith.constant 1.000000e+00 : f32
    %8 = vector.broadcast %cst_5 : f32 to vector<8x64xf32>
    %9 = arith.addf %8, %7 : vector<8x64xf32>
    %10 = arith.divf %8, %9 : vector<8x64xf32>
    %11 = vector.extract_strided_slice %4 {offsets = [0, 64], sizes = [8, 64], strides = [1, 1]} : vector<8x192xf32> to vector<8x64xf32>
    %12 = math.tanh %11 : vector<8x64xf32>
    %13 = vector.extract_strided_slice %4 {offsets = [0, 128], sizes = [8, 64], strides = [1, 1]} : vector<8x192xf32> to vector<8x64xf32>
    %14 = arith.negf %13 : vector<8x64xf32>
    %15 = math.exp %14 : vector<8x64xf32>
    %cst_6 = arith.constant 1.000000e+00 : f32
    %16 = vector.broadcast %cst_6 : f32 to vector<8x64xf32>
    %17 = arith.addf %16, %15 : vector<8x64xf32>
    %18 = arith.divf %16, %17 : vector<8x64xf32>
    %19 = arith.mulf %10, %12 : vector<8x64xf32>
    %20 = math.tanh %19 : vector<8x64xf32>
    %21 = arith.mulf %18, %20 : vector<8x64xf32>
    %c1 = arith.constant 1 : index
    %c0_7 = arith.constant 0 : index
    %c0_8 = arith.constant 0 : index
    %22 = vector.load %arg0[%c1, %c0_7, %c0_8] : memref<3x8x51xf32, #tpu.memory_space<vmem>>, vector<1x8x51xf32>
    %23 = vector.shape_cast %22 : vector<1x8x51xf32> to vector<8x51xf32>
    %c1_9 = arith.constant 1 : index
    %c0_10 = arith.constant 0 : index
    %c0_11 = arith.constant 0 : index
    %24 = vector.load %arg1[%c1_9, %c0_10, %c0_11] : memref<3x51x192xf32, #tpu.memory_space<vmem>>, vector<1x51x192xf32>
    %25 = vector.shape_cast %24 : vector<1x51x192xf32> to vector<51x192xf32>
    %cst_12 = arith.constant dense<0.000000e+00> : vector<8x192xf32>
    %26 = tpu.matmul %23, %25, %cst_12 {dimension_numbers = #tpu.dot_dimension_numbers<[1], [0], [0], [1], [0, 0, 1, 1], [], []>} : vector<8x51xf32>, vector<51x192xf32>, vector<8x192xf32> -> vector<8x192xf32>
    %27 = vector.extract_strided_slice %26 {offsets = [0, 0], sizes = [8, 64], strides = [1, 1]} : vector<8x192xf32> to vector<8x64xf32>
    %28 = arith.negf %27 : vector<8x64xf32>
    %29 = math.exp %28 : vector<8x64xf32>
    %cst_13 = arith.constant 1.000000e+00 : f32
    %30 = vector.broadcast %cst_13 : f32 to vector<8x64xf32>
    %31 = arith.addf %30, %29 : vector<8x64xf32>
    %32 = arith.divf %30, %31 : vector<8x64xf32>
    %33 = vector.extract_strided_slice %26 {offsets = [0, 64], sizes = [8, 64], strides = [1, 1]} : vector<8x192xf32> to vector<8x64xf32>
    %34 = math.tanh %33 : vector<8x64xf32>
    %35 = vector.extract_strided_slice %26 {offsets = [0, 128], sizes = [8, 64], strides = [1, 1]} : vector<8x192xf32> to vector<8x64xf32>
    %36 = arith.negf %35 : vector<8x64xf32>
    %37 = math.exp %36 : vector<8x64xf32>
    %cst_14 = arith.constant 1.000000e+00 : f32
    %38 = vector.broadcast %cst_14 : f32 to vector<8x64xf32>
    %39 = arith.addf %38, %37 : vector<8x64xf32>
    %40 = arith.divf %38, %39 : vector<8x64xf32>
    %41 = arith.mulf %32, %34 : vector<8x64xf32>
    %42 = math.tanh %41 : vector<8x64xf32>
    %43 = arith.mulf %40, %42 : vector<8x64xf32>
    %c2 = arith.constant 2 : index
    %c0_15 = arith.constant 0 : index
    %c0_16 = arith.constant 0 : index
    %44 = vector.load %arg0[%c2, %c0_15, %c0_16] : memref<3x8x51xf32, #tpu.memory_space<vmem>>, vector<1x8x51xf32>
    %45 = vector.shape_cast %44 : vector<1x8x51xf32> to vector<8x51xf32>
    %c2_17 = arith.constant 2 : index
    %c0_18 = arith.constant 0 : index
    %c0_19 = arith.constant 0 : index
    %46 = vector.load %arg1[%c2_17, %c0_18, %c0_19] : memref<3x51x192xf32, #tpu.memory_space<vmem>>, vector<1x51x192xf32>
    %47 = vector.shape_cast %46 : vector<1x51x192xf32> to vector<51x192xf32>
    %cst_20 = arith.constant dense<0.000000e+00> : vector<8x192xf32>
    %48 = tpu.matmul %45, %47, %cst_20 {dimension_numbers = #tpu.dot_dimension_numbers<[1], [0], [0], [1], [0, 0, 1, 1], [], []>} : vector<8x51xf32>, vector<51x192xf32>, vector<8x192xf32> -> vector<8x192xf32>
    %49 = vector.extract_strided_slice %48 {offsets = [0, 0], sizes = [8, 64], strides = [1, 1]} : vector<8x192xf32> to vector<8x64xf32>
    %50 = arith.negf %49 : vector<8x64xf32>
    %51 = math.exp %50 : vector<8x64xf32>
    %cst_21 = arith.constant 1.000000e+00 : f32
    %52 = vector.broadcast %cst_21 : f32 to vector<8x64xf32>
    %53 = arith.addf %52, %51 : vector<8x64xf32>
    %54 = arith.divf %52, %53 : vector<8x64xf32>
    %55 = vector.extract_strided_slice %48 {offsets = [0, 64], sizes = [8, 64], strides = [1, 1]} : vector<8x192xf32> to vector<8x64xf32>
    %56 = math.tanh %55 : vector<8x64xf32>
    %57 = vector.extract_strided_slice %48 {offsets = [0, 128], sizes = [8, 64], strides = [1, 1]} : vector<8x192xf32> to vector<8x64xf32>
    %58 = arith.negf %57 : vector<8x64xf32>
    %59 = math.exp %58 : vector<8x64xf32>
    %cst_22 = arith.constant 1.000000e+00 : f32
    %60 = vector.broadcast %cst_22 : f32 to vector<8x64xf32>
    %61 = arith.addf %60, %59 : vector<8x64xf32>
    %62 = arith.divf %60, %61 : vector<8x64xf32>
    %63 = arith.mulf %54, %56 : vector<8x64xf32>
    %64 = math.tanh %63 : vector<8x64xf32>
    %65 = arith.mulf %62, %64 : vector<8x64xf32>
    %66 = arith.mulf %21, %21 : vector<8x64xf32>
    %cst_23 = arith.constant dense<0.000000e+00> : vector<8xf32>
    %67 = vector.multi_reduction <add>, %66, %cst_23 [1] : vector<8x64xf32> to vector<8xf32>
    %68 = vector.shape_cast %67 : vector<8xf32> to vector<8x1xf32>
    %69 = arith.mulf %43, %43 : vector<8x64xf32>
    %cst_24 = arith.constant dense<0.000000e+00> : vector<8xf32>
    %70 = vector.multi_reduction <add>, %69, %cst_24 [1] : vector<8x64xf32> to vector<8xf32>
    %71 = vector.shape_cast %70 : vector<8xf32> to vector<8x1xf32>
    %72 = arith.mulf %65, %65 : vector<8x64xf32>
    %cst_25 = arith.constant dense<0.000000e+00> : vector<8xf32>
    %73 = vector.multi_reduction <add>, %72, %cst_25 [1] : vector<8x64xf32> to vector<8xf32>
    %74 = vector.shape_cast %73 : vector<8xf32> to vector<8x1xf32>
    %75 = arith.mulf %21, %43 : vector<8x64xf32>
    %cst_26 = arith.constant dense<0.000000e+00> : vector<8xf32>
    %76 = vector.multi_reduction <add>, %75, %cst_26 [1] : vector<8x64xf32> to vector<8xf32>
    %77 = vector.shape_cast %76 : vector<8xf32> to vector<8x1xf32>
    %78 = arith.mulf %21, %65 : vector<8x64xf32>
    %cst_27 = arith.constant dense<0.000000e+00> : vector<8xf32>
    %79 = vector.multi_reduction <add>, %78, %cst_27 [1] : vector<8x64xf32> to vector<8xf32>
    %80 = vector.shape_cast %79 : vector<8xf32> to vector<8x1xf32>
    %81 = arith.mulf %68, %71 : vector<8x1xf32>
    %cst_28 = arith.constant 1.000000e-16 : f32
    %82 = vector.broadcast %cst_28 : f32 to vector<8x1xf32>
    %83 = arith.maximumf %81, %82 : vector<8x1xf32>
    %84 = math.rsqrt %83 : vector<8x1xf32>
    %85 = arith.mulf %77, %84 : vector<8x1xf32>
    %86 = arith.mulf %68, %74 : vector<8x1xf32>
    %cst_29 = arith.constant 1.000000e-16 : f32
    %87 = vector.broadcast %cst_29 : f32 to vector<8x1xf32>
    %88 = arith.maximumf %86, %87 : vector<8x1xf32>
    %89 = math.rsqrt %88 : vector<8x1xf32>
    %90 = arith.mulf %80, %89 : vector<8x1xf32>
    %91 = arith.maximumf %85, %90 : vector<8x1xf32>
    %c0_30 = arith.constant 0 : index
    %c0_31 = arith.constant 0 : index
    %92 = vector.load %arg2[%c0_30, %c0_31] : memref<8x1xf32, #tpu.memory_space<vmem>>, vector<8x1xf32>
    tpu.vector_store %arg2[%c0_30, %c0_31], %91 {strides = array<i32>} : memref<8x1xf32, #tpu.memory_space<vmem>>, vector<8x1xf32>,
    return
  }
}

</mosaic_0001>

<bundles_post_ra>
// kernel: adv_model_forward.1
= control target key start
LH: loop header
LB: loop body
LE: loop exit
PB: predicated region body
PF: predicated region fallthrough
CT: control target
= control target key end

     0   :  { %7 = vsyncpa [#allocation3], 0  ;;  %s508_s12 = smov [#allocation2]   ;;  %s509_s14 = smov 256   ;;  %s637_s0 = inlined_call_operand.vmem [shape: f32[3,8,51], index: 0, kind: input, shape index: {}]   ;;  %s638_s1 = inlined_call_operand.hbm [shape: f32[3,51,192], index: 1, kind: input, shape index: {}]   ;;  %s639_s2 = inlined_call_operand.vmem [shape: f32[8,1], index: 2, kind: output, shape index: {}]  }
   0x1   :  { %s14_s11 = sshll.u32 %s638_s1, 4  ;;  %s16_s13 = sshll.u32 %s508_s12, 4  ;;  %s15_s11 = int_to_ptr.hbm [resolvable:$true] %s14_s11  ;;  %s17_s13 = int_to_ptr.vmem [resolvable:$true] %s16_s13 }
   0x2   :  { %s510_s15 = smov 16  }
   0x3   :  { %22 = dma.hbm_to_vmem [thread:$0]  %s15_s11, 5376, %s17_s13, [#allocation3], %s509_s14, %s509_s14, %s510_s15  }
   0x4   :  { %506 = dma.done.wait [#allocation3], 5376  }
   0x5   :  { %507 = vsyncadd [#allocation3], 4294961920  ;;  %vm46_vm0 = vcmask 1042432   ;;  %v40_v0 = vld [vmem:[#allocation2 + $0x60] sm:$0x7]  ;;  %v38_v2 = vld [vmem:[#allocation2 + $0x50] sm:$0xff] }
   0x6   :  { %v154_v1 = vld [vmem:[#allocation2 + $0xd0] sm:$0x7]  ;;  %418 = vmatpush.msk.msra.mxu0 %vm46_vm0, %v40_v0  ;;  %v152_v3 = vld [vmem:[#allocation2 + $0xc0] sm:$0xff]  ;;  %v155_v12 = vld [vmem:[#allocation2 + $0xd8] sm:$0x7]  ;;  %vm42_vm1 = vcmask 416768  }
   0x7   :  { %425 = vmatpush.msk.msra.mxu2 %vm46_vm0, %v154_v1  ;;  %v36_v4 = vld [vmem:[#allocation2 + $0x40] sm:$0xff]  ;;  %v150_v5 = vld [vmem:[#allocation2 + $0xb0] sm:$0xff]  ;;  %v41_v13 = vld [vmem:[#allocation2 + $0x68] sm:$0x7]  ;;  %427 = vmatpush.msk.msra.mxu3 %vm46_vm0, %v155_v12 }
   0x8   :  { %63 = vmatpush.msra.mxu0 %v38_v2  ;;  %v34_v6 = vld [vmem:[#allocation2 + $0x30] sm:$0xff]  ;;  %v148_v7 = vld [vmem:[#allocation2 + $0xa0] sm:$0xff]  ;;  %v153_v14 = vld [vmem:[#allocation2 + $0xc8] sm:$0xff]  ;;  %420 = vmatpush.msk.msra.mxu1 %vm46_vm0, %v41_v13 }
   0x9   :  { %175 = vmatpush.msra.mxu2 %v152_v3  ;;  %v32_v8 = vld [vmem:[#allocation2 + $0x20] sm:$0xff]  ;;  %v146_v9 = vld [vmem:[#allocation2 + $0x90] sm:$0xff]  ;;  %v39_v15 = vld [vmem:[#allocation2 + $0x58] sm:$0xff]  ;;  %195 = vmatpush.msra.mxu3 %v153_v14 }
   0xa   :  { %64 = vmatpush.msra.mxu0 %v36_v4  ;;  %v30_v10 = vld [vmem:[#allocation2 + $0x10] sm:$0xff]  ;;  %v144_v11 = vld [vmem:[#allocation2 + $0x80] sm:$0xff]  ;;  %v424_v19 = vld [vmem:[%s637_s0 + $0x8] sm:$0xff]  ;;  %83 = vmatpush.msra.mxu1 %v39_v15 }
   0xb   :  { %176 = vmatpush.msra.mxu2 %v150_v5  ;;  %v28_v16 = vld [vmem:[#allocation2] sm:$0xff]  ;;  %v142_v17 = vld [vmem:[#allocation2 + $0x70] sm:$0xff]  ;;  %v151_v21 = vld [vmem:[#allocation2 + $0xb8] sm:$0xff] }
   0xc   :  { %65 = vmatpush.msra.mxu0 %v34_v6  ;;  %v27_v18 = vld [vmem:[%s637_s0] sm:$0xff]  ;;  %v37_v22 = vld [vmem:[#allocation2 + $0x48] sm:$0xff]  ;;  %v264_v23 = vld [vmem:[#allocation2 + $0x130] sm:$0xff]  ;;  %196 = vmatpush.msra.mxu3 %v151_v21 }
   0xd   :  { %177 = vmatpush.msra.mxu2 %v148_v7  ;;  %v266_v20 = vld [vmem:[#allocation2 + $0x140] sm:$0x7]  ;;  %v149_v24 = vld [vmem:[#allocation2 + $0xa8] sm:$0xff]  ;;  %v35_v25 = vld [vmem:[#allocation2 + $0x38] sm:$0xff]  ;;  %84 = vmatpush.msra.mxu1 %v37_v22 }
   0xe   :  { %66 = vmatpush.msra.mxu0 %v32_v8  ;;  %v262_v26 = vld [vmem:[#allocation2 + $0x120] sm:$0xff]  ;;  %v147_v27 = vld [vmem:[#allocation2 + $0x98] sm:$0xff]  ;;  %197 = vmatpush.msra.mxu3 %v149_v24  ;;  %v33_v28 = vld [vmem:[#allocation2 + $0x28] sm:$0xff] }
   0xf   :  { %178 = vmatpush.msra.mxu2 %v146_v9  ;;  %v260_v29 = vld [vmem:[#allocation2 + $0x110] sm:$0xff]  ;;  %85 = vmatpush.msra.mxu1 %v35_v25  ;;  %v145_v30 = vld [vmem:[#allocation2 + $0x88] sm:$0xff]  ;;  %v31_v31 = vld [vmem:[#allocation2 + $0x18] sm:$0xff] }
  0x10   :  { %67 = vmatpush.msra.mxu0 %v30_v10  ;;  %198 = vmatpush.msra.mxu3 %v147_v27  ;;  %v258_v32 = vld [vmem:[#allocation2 + $0x100] sm:$0xff]  ;;  %v143_v33 = vld [vmem:[#allocation2 + $0x78] sm:$0xff]  ;;  %v29_v34 = vld [vmem:[#allocation2 + $0x8] sm:$0xff] }
  0x11   :  { %179 = vmatpush.msra.mxu2 %v144_v11  ;;  %86 = vmatpush.msra.mxu1 %v33_v28  ;;  %v256_v35 = vld [vmem:[#allocation2 + $0xf0] sm:$0xff]  ;;  %v267_v36 = vld [vmem:[#allocation2 + $0x148] sm:$0x7]  ;;  %v254_v37 = vld [vmem:[#allocation2 + $0xe0] sm:$0xff] }
  0x12   :  { %68 = vmatpush.msra.mxu0 %v28_v16  ;;  %199 = vmatpush.msra.mxu3 %v145_v30  ;;  %v265_v38 = vld [vmem:[#allocation2 + $0x138] sm:$0xff]  ;;  %v431_v39 = vld [vmem:[%s637_s0 + $0x10] sm:$0xff]  ;;  %v263_v40 = vld [vmem:[#allocation2 + $0x128] sm:$0xff]  ;;  %s511_s0 = smov 64  }
  0x13   :  { %180 = vmatpush.msra.mxu2 %v142_v17  ;;  %419 = vmatmul.msk.f32.vlgmr.msra.gmra.mxu0 %vm42_vm1, %v27_v18  ;;  %v261_v41 = vld [vmem:[#allocation2 + $0x118] sm:$0xff]  ;;  %v259_v42 = vld [vmem:[#allocation2 + $0x108] sm:$0xff] }
  0x14   :  { %426 = vmatmul.msk.f32.vlgmr.msra.gmra.mxu2 %vm42_vm1, %v424_v19  ;;  %432 = vmatpush.msk.msrb.mxu0 %vm46_vm0, %v266_v20  ;;  %v257_v43 = vld [vmem:[#allocation2 + $0xf8] sm:$0xff]  ;;  %v255_v44 = vld [vmem:[#allocation2 + $0xe8] sm:$0xff] }
  0x15   :  { %87 = vmatpush.msra.mxu1 %v31_v31  ;;  %200 = vmatpush.msra.mxu3 %v143_v33 }
  0x16   :  { %287 = vmatpush.msrb.mxu0 %v264_v23  ;;  %428 = vmatmul.msk.f32.vlgmr.msra.gmra.mxu3 %vm42_vm1, %v424_v19 }
  0x17   :  { %88 = vmatpush.msra.mxu1 %v29_v34 }
  0x18   :  { %288 = vmatpush.msrb.mxu0 %v262_v26  ;;  %421 = vmatmul.msk.f32.vlgmr.msra.gmra.mxu1 %vm42_vm1, %v27_v18 }
  0x19   :  { %434 = vmatpush.msk.msrb.mxu1 %vm46_vm0, %v267_v36 }
  0x1a   :  { %289 = vmatpush.msrb.mxu0 %v260_v29 }
  0x1b   :  { %307 = vmatpush.msrb.mxu1 %v265_v38 }
  0x1c   :  { %290 = vmatpush.msrb.mxu0 %v258_v32 }
  0x1d   :  { %308 = vmatpush.msrb.mxu1 %v263_v40 }
  0x1e   :  { %291 = vmatpush.msrb.mxu0 %v256_v35 }
  0x1f   :  { %309 = vmatpush.msrb.mxu1 %v261_v41 }
  0x20   :  { %292 = vmatpush.msrb.mxu0 %v254_v37 }
  0x21   :  { %433 = vmatmul.msk.f32.vlgmr.msrb.gmra.mxu0 %vm42_vm1, %v431_v39  ;;  %310 = vmatpush.msrb.mxu1 %v259_v42 }
  0x23   :  { %311 = vmatpush.msrb.mxu1 %v257_v43 }
  0x25   :  { %312 = vmatpush.msrb.mxu1 %v255_v44 }
  0x26   :  { %435 = vmatmul.msk.f32.vlgmr.msrb.gmra.mxu1 %vm42_vm1, %v431_v39 }
  0x90   :  { %v70_v45 = vpop.f32.mrf.mxu0 }
  0x91   :  { %442 = vtanh.f32 %v70_v45  ;;  %v422_v51 = vmul.f32 -1.442695, %v70_v45 }
  0x95   :  { %v90_v52 = vpop.f32.mrf.mxu1 }
  0x96   :  { %v423_v55 = vmul.f32 -1.442695, %v90_v52 }
  0x97   :  { %v182_v46 = vpop.f32.mrf.mxu2  ;;  %v443_v47 = vpop.eup %442 }
  0x98   :  { %444 = vtanh.f32 %v182_v46  ;;  %133 = vrot.lane.b32.xlu0 %v443_v47, %s511_s0  ;;  %v429_v53 = vmul.f32 -1.442695, %v182_v46 }
  0x99   :  { %v202_v58 = vpop.f32.mrf.mxu3 }
  0x9a   :  { %v430_v59 = vmul.f32 -1.442695, %v202_v58 }
  0x9e   :  { %v445_v48 = vpop.eup %444  ;;  %v294_v49 = vpop.f32.mrf.mxu0 }
  0x9f   :  { %446 = vtanh.f32 %v294_v49  ;;  %v436_v57 = vmul.f32 -1.442695, %v294_v49 }
  0xa0   :  { %245 = vrot.lane.b32.xlu0 %v445_v48, %s511_s0  ;;  %448 = vpow2.f32 %v422_v51 }
  0xa1   :  { %450 = vpow2.f32 %v429_v53 }
  0xa2   :  { %452 = vpow2.f32 %v423_v55 }
  0xa3   :  { %v314_v62 = vpop.f32.mrf.mxu1 }
  0xa4   :  { %v437_v3 = vmul.f32 -1.442695, %v314_v62 }
  0xa5   :  { %v447_v50 = vpop.eup %446 }
  0xa6   :  { %357 = vrot.lane.b32.xlu1 %v447_v50, %s511_s0  ;;  %v449_v54 = vpop.eup %448 }
  0xa7   :  { %v96_v56 = vadd.f32 1.0, %v449_v54  ;;  %v451_v60 = vpop.eup %450 }
  0xa8   :  { %v453_v61 = vpop.eup %452  ;;  %v551_v63 = vadd.f32 1.0, %v451_v60 }
  0xa9   :  { %454 = vrcp.f32 %v96_v56  ;;  %v553_v1 = vadd.f32 1.0, %v453_v61  ;;  %v108_v21 = vand.u32 2147483648, %v96_v56  ;;  %vm102_vm3 = vweird.f32 %v96_v56 }
  0xaa   :  { %456 = vpow2.f32 %v436_v57  ;;  %v106_v23 = vand.u32 2147483647, %v96_v56  ;;  %v220_v30 = vand.u32 2147483648, %v551_v63  ;;  %vm214_vm9 = vweird.f32 %v551_v63 }
  0xab   :  { %458 = vpow2.f32 %v430_v59  ;;  %v109_v27 = vor.u32 1.1754944e-38, %v108_v21  ;;  %vm122_vm7 = vweird.f32 %v553_v1  ;;  %v128_v37 = vand.u32 2147483648, %v553_v1 }
  0xac   :  { %460 = vrcp.f32 %v551_v63  ;;  %vm107_vm5 = vcmp.eq.f32.partialorder %v106_v23, 8.507059e+37  ;;  %v126_v40 = vand.u32 2147483647, %v553_v1  ;;  %v218_v41 = vand.u32 2147483647, %v551_v63 }
  0xad   :  { %462 = vrcp.f32 %v553_v1  ;;  %v221_v45 = vor.u32 1.1754944e-38, %v220_v30  ;;  %v129_v46 = vor.u32 1.1754944e-38, %v128_v37 }
  0xae   :  { %464 = vpow2.f32 %v437_v3  ;;  %vm127_vm13 = vcmp.eq.f32.partialorder %v126_v40, 8.507059e+37  ;;  %vm219_vm14 = vcmp.eq.f32.partialorder %v218_v41, 8.507059e+37 }
  0xaf   :  { %v455_v0 = vpop.eup %454 }
  0xb0   :  { %v457_v2 = vpop.eup %456  ;;  %v98_v6 = vmul.f32 %v455_v0, %v96_v56  ;;  %vm103_vm2 = vweird.f32 %v455_v0 }
  0xb1   :  { %v459_v4 = vpop.eup %458  ;;  %v556_v5 = vadd.f32 1.0, %v457_v2  ;;  %vm104_vm4 = vmor %vm102_vm3, %vm103_vm2 }
  0xb2   :  { %v559_v7 = vadd.f32 1.0, %v459_v4  ;;  %v99_v8 = vsub.f32 1.0, %v98_v6  ;;  %v461_v9 = vpop.eup %460 }
  0xb3   :  { %466 = vrcp.f32 %v556_v5  ;;  %v562_v10 = vpop.eup %462  ;;  %v210_v13 = vmul.f32 %v461_v9, %v551_v63  ;;  %vm215_vm6 = vweird.f32 %v461_v9  ;;  %v332_v50 = vand.u32 2147483648, %v556_v5 }
  0xb4   :  { %v465_v11 = vpop.eup %464  ;;  %468 = vrcp.f32 %v559_v7  ;;  %v100_v12 = vmul.f32 %v455_v0, %v99_v8  ;;  %v118_v14 = vmul.f32 %v562_v10, %v553_v1  ;;  %vm123_vm8 = vweird.f32 %v562_v10  ;;  %vm216_vm11 = vmor %vm214_vm9, %vm215_vm6 }
  0xb5   :  { %v570_v16 = vadd.f32 1.0, %v465_v11  ;;  %v211_v18 = vsub.f32 1.0, %v210_v13  ;;  %vm591_vm10 = vmor %vm122_vm7, %vm123_vm8  ;;  %vm234_vm15 = vweird.f32 %v559_v7  ;;  %vm326_vm1 = vweird.f32 %v556_v5 }
  0xb6   :  { %v101_v17 = vadd.f32 %v455_v0, %v100_v12  ;;  %v119_v20 = vsub.f32 1.0, %v118_v14  ;;  %v330_v54 = vand.u32 2147483647, %v556_v5  ;;  %v240_v59 = vand.u32 2147483648, %v559_v7 }
  0xb7   :  { %470 = vrcp.f32 %v570_v16  ;;  %v212_v26 = vmul.f32 %v461_v9, %v211_v18  ;;  %v238_v63 = vand.u32 2147483647, %v559_v7  ;;  %vm346_vm7 = vweird.f32 %v570_v16 }
  0xb8   :  { %v105_v25 = vsel %vm104_vm4, %v455_v0, %v101_v17  ;;  %v120_v29 = vmul.f32 %v562_v10, %v119_v20  ;;  %v333_v0 = vor.u32 1.1754944e-38, %v332_v50  ;;  %vm364_vm4 = vcmask 523264  }
  0xb9   :  { %v568_v15 = vpop.eup %466  ;;  %v110_v32 = vsel %vm107_vm5, %v109_v27, %v105_v25  ;;  %v213_v36 = vadd.f32 %v461_v9, %v212_v26  ;;  %vm331_vm5 = vcmp.eq.f32.partialorder %v330_v54, 8.507059e+37  ;;  %vm239_vm6 = vcmp.eq.f32.partialorder %v238_v63, 8.507059e+37 }
  0xba   :  { %v572_v19 = vpop.eup %468  ;;  %v322_v22 = vmul.f32 %v568_v15, %v556_v5  ;;  %v121_v39 = vadd.f32 %v562_v10, %v120_v29  ;;  %vm327_vm12 = vweird.f32 %v568_v15  ;;  %v241_v5 = vor.u32 1.1754944e-38, %v240_v59 }
  0xbb   :  { %v230_v24 = vmul.f32 %v572_v19, %v559_v7  ;;  %v217_v44 = vsel %vm216_vm11, %v461_v9, %v213_v36  ;;  %vm235_vm0 = vweird.f32 %v572_v19  ;;  %vm328_vm2 = vmor %vm326_vm1, %vm327_vm12  ;;  %v352_v9 = vand.u32 2147483648, %v570_v16 }
  0xbc   :  { %v323_v28 = vsub.f32 1.0, %v322_v22  ;;  %v125_v49 = vsel %vm591_vm10, %v562_v10, %v121_v39  ;;  %v222_v52 = vsel %vm219_vm14, %v221_v45, %v217_v44  ;;  %vm614_vm3 = vmor %vm234_vm15, %vm235_vm0  ;;  %v350_v11 = vand.u32 2147483647, %v570_v16 }
  0xbd   :  { %v583_v33 = vpop.eup %470  ;;  %v231_v34 = vsub.f32 1.0, %v230_v24  ;;  %v130_v57 = vsel %vm127_vm13, %v129_v46, %v125_v49  ;;  %vm411_vm1 = vcmask 7168  }
  0xbe   :  { %v324_v38 = vmul.f32 %v568_v15, %v323_v28  ;;  %v342_v43 = vmul.f32 %v583_v33, %v570_v16  ;;  %vm347_vm8 = vweird.f32 %v583_v33  ;;  %vm351_vm10 = vcmp.eq.f32.partialorder %v350_v11, 8.507059e+37 }
  0xbf   :  { %v232_v47 = vmul.f32 %v572_v19, %v231_v34  ;;  %vm348_vm9 = vmor %vm346_vm7, %vm347_vm8 }
  0xc0   :  { %v325_v48 = vadd.f32 %v568_v15, %v324_v38  ;;  %v343_v51 = vsub.f32 1.0, %v342_v43 }
  0xc1   :  { %v233_v58 = vadd.f32 %v572_v19, %v232_v47 }
  0xc2   :  { %v329_v60 = vsel %vm328_vm2, %v568_v15, %v325_v48  ;;  %v344_v2 = vmul.f32 %v583_v33, %v343_v51  ;;  %v353_v15 = vor.u32 1.1754944e-38, %v352_v9 }
  0xc3   :  { %v334_v3 = vsel %vm331_vm5, %v333_v0, %v329_v60  ;;  %v237_v4 = vsel %vm614_vm3, %v572_v19, %v233_v58 }
  0xc4   :  { %v345_v10 = vadd.f32 %v583_v33, %v344_v2  ;;  %v242_v13 = vsel %vm239_vm6, %v241_v5, %v237_v4 }
  0xc6   :  { %v349_v19 = vsel %vm348_vm9, %v583_v33, %v345_v10 }
  0xc7   :  { %v354_v23 = vsel %vm351_vm10, %v353_v15, %v349_v19 }
 0x10a   :  { %v134_v31 = vpop.permute.xlu0 %133 }
 0x10b   :  { %v136_v35 = vmul.f32 %v134_v31, %v110_v32 }
 0x10d   :  { %472 = vtanh.f32 %v136_v35 }
 0x112   :  { %v246_v53 = vpop.permute.xlu0 %245 }
 0x113   :  { %v473_v55 = vpop.eup %472  ;;  %v248_v56 = vmul.f32 %v246_v53, %v222_v52 }
 0x114   :  { %v138_v61 = vmul.f32 %v473_v55, %v130_v57 }
 0x115   :  { %474 = vtanh.f32 %v248_v56 }
 0x116   :  { %v363_v1 = vmul.f32 %v138_v61, %v138_v61 }
 0x118   :  { %v358_v6 = vpop.permute.xlu1 %357  ;;  %v365_v8 = vsel %vm364_vm4, %v363_v1, 0.0 }
 0x119   :  { %v360_v7 = vmul.f32 %v358_v6, %v334_v3  ;;  %366 = vadd.xlane.f32.xlu1 %v365_v8 }
 0x11b   :  { %v475_v12 = vpop.eup %474  ;;  %476 = vtanh.f32 %v360_v7 }
 0x11c   :  { %v250_v14 = vmul.f32 %v475_v12, %v242_v13 }
 0x11e   :  { %v368_v17 = vmul.f32 %v250_v14, %v250_v14  ;;  %v376_v18 = vmul.f32 %v250_v14, %v138_v61 }
 0x120   :  { %v369_v20 = vsel %vm364_vm4, %v368_v17, 0.0  ;;  %v377_v21 = vsel %vm364_vm4, %v376_v18, 0.0 }
 0x121   :  { %v477_v22 = vpop.eup %476  ;;  %370 = vadd.xlane.f32.xlu2 %v369_v20  ;;  %378 = vadd.xlane.f32.xlu0 %v377_v21 }
 0x122   :  { %v362_v16 = vmul.f32 %v477_v22, %v354_v23 }
 0x124   :  { %v372_v24 = vmul.f32 %v362_v16, %v362_v16  ;;  %v380_v25 = vmul.f32 %v362_v16, %v138_v61 }
 0x126   :  { %v373_v26 = vsel %vm364_vm4, %v372_v24, 0.0  ;;  %v381_v27 = vsel %vm364_vm4, %v380_v25, 0.0 }
 0x129   :  { %374 = vadd.xlane.f32.xlu2 %v373_v26 }
 0x131   :  { %382 = vadd.xlane.f32.xlu2 %v381_v27 }
 0x18c   :  { %v367_v28 = vpop.xlane.xlu1 %366 }
 0x194   :  { %v371_v29 = vpop.xlane.xlu2 %370  ;;  %v379_v48 = vpop.xlane.xlu0 %378 }
 0x195   :  { %v384_v30 = vmul.f32 %v371_v29, %v367_v28 }
 0x197   :  { %v385_v31 = vmax.f32 %v384_v30, 1e-16 }
 0x199   :  { %478 = vrsqrt.f32 %v385_v31  ;;  %vm392_vm12 = vweird.f32 %v385_v31 }
 0x19c   :  { %v375_v32 = vpop.xlane.xlu2 %374 }
 0x19d   :  { %v397_v33 = vmul.f32 %v375_v32, %v367_v28 }
 0x19f   :  { %v479_v34 = vpop.eup %478  ;;  %v398_v35 = vmax.f32 %v397_v33, 1e-16 }
 0x1a0   :  { %v387_v36 = vmul.f32 %v479_v34, %v385_v31  ;;  %vm393_vm11 = vweird.f32 %v479_v34 }
 0x1a1   :  { %480 = vrsqrt.f32 %v398_v35  ;;  %vm394_vm14 = vmor %vm392_vm12, %vm393_vm11  ;;  %vm405_vm15 = vweird.f32 %v398_v35 }
 0x1a2   :  { %v388_v37 = vmul.f32 %v479_v34, %v387_v36 }
 0x1a4   :  { %v389_v38 = vmul.f32 0.5, %v388_v37  ;;  %v383_v49 = vpop.xlane.xlu2 %382 }
 0x1a6   :  { %v390_v40 = vsub.f32 1.5, %v389_v38 }
 0x1a7   :  { %v481_v39 = vpop.eup %480 }
 0x1a8   :  { %v400_v41 = vmul.f32 %v481_v39, %v398_v35  ;;  %v391_v43 = vmul.f32 %v479_v34, %v390_v40  ;;  %vm406_vm13 = vweird.f32 %v481_v39 }
 0x1a9   :  { %vm407_vm0 = vmor %vm405_vm15, %vm406_vm13 }
 0x1aa   :  { %v401_v42 = vmul.f32 %v481_v39, %v400_v41  ;;  %v395_v46 = vsel %vm394_vm14, %v479_v34, %v391_v43 }
 0x1ab   :  { %v396_v51 = vmul.f32 %v395_v46, %v379_v48 }
 0x1ac   :  { %v402_v44 = vmul.f32 0.5, %v401_v42 }
 0x1ae   :  { %v403_v45 = vsub.f32 1.5, %v402_v44 }
 0x1b0   :  { %v404_v47 = vmul.f32 %v481_v39, %v403_v45 }
 0x1b2   :  { %v408_v50 = vsel %vm407_vm0, %v481_v39, %v404_v47 }
 0x1b3   :  { %v409_v52 = vmul.f32 %v408_v50, %v383_v49 }
 0x1b5   :  { %v410_v53 = vmax.f32 %v396_v51, %v409_v52 }
 0x1b7   :  { %412 = vst.msk [vmem:[%s639_s2] sm:$0xff] %vm411_vm1, %v410_v53 }
 0x1b8   :  { %417 = vsyncpa [#allocation3], 1 }

</bundles_post_ra>
